<compile_context>
chip_gen: v6e
topology: v6e:2x2x1
jax: 0.10.0
libtpu: 0.0.40
codegen_flags: <defaults>
</compile_context>

<pallas_src>
import functools

import jax
import jax.numpy as jnp
from jax.experimental import pallas as pl
from jax.experimental.pallas import tpu as pltpu


# --------------------------------------------------------------------------
# in-kernel helpers (operate on values, not refs)
# --------------------------------------------------------------------------
def _mish(x):
    # x * tanh(softplus(x)), softplus threshold=20 like torch
    sp = jnp.where(x > 20.0, x, jnp.log1p(jnp.exp(jnp.minimum(x, 20.0))))
    return x * jnp.tanh(sp)


def _group_norm(x, gmat, gamma, beta, eps=1e-5):
    # x: (C, HW) f32.  gmat: (C, C) with gmat[i,j] = 1/(cg*HW) if same group.
    # Single pass: per-channel sum / sumsq reduced over lanes, then mixed into
    # per-group stats with one tiny matmul (no per-group slicing).
    s1 = jnp.sum(x, axis=-1, keepdims=True)          # (C, 1)
    s2 = jnp.sum(x * x, axis=-1, keepdims=True)      # (C, 1)
    mean = jnp.dot(gmat, s1, preferred_element_type=jnp.float32)   # (C, 1)
    ex2 = jnp.dot(gmat, s2, preferred_element_type=jnp.float32)    # (C, 1)
    var = ex2 - mean * mean
    xn = (x - mean) * jax.lax.rsqrt(var + eps)
    return xn * gamma + beta


def _conv3x3(a, w_ref, W):
    # a: (Cin, HW) f32 activation.  w_ref: Ref (9, Cout, Cin), tap = ky*3+kx.
    # 3x3 conv, padding=1, as 9 accumulated MXU matmuls over shifted views.
    Cin, HW = a.shape
    col = jax.lax.broadcasted_iota(jnp.int32, (1, HW), 1) % W   # output x coord
    a_bf = a.astype(jnp.bfloat16)
    acc = None
    for ky in range(3):
        for kx in range(3):
            s = (ky - 1) * W + (kx - 1)              # flat read offset
            if s > 0:
                t = jnp.concatenate(
                    [a_bf[:, s:], jnp.zeros((Cin, s), a_bf.dtype)], axis=-1)
            elif s < 0:
                t = jnp.concatenate(
                    [jnp.zeros((Cin, -s), a_bf.dtype), a_bf[:, :HW + s]],
                    axis=-1)
            else:
                t = a_bf
            # mask columns that would read across a row edge
            if kx == 0:                               # needs x-1 >= 0
                t = jnp.where(col >= 1, t, jnp.zeros_like(t))
            elif kx == 2:                             # needs x+1 <= W-1
                t = jnp.where(col <= W - 2, t, jnp.zeros_like(t))
            wtap = w_ref[ky * 3 + kx].astype(jnp.bfloat16)       # (Cout, Cin)
            part = jnp.dot(wtap, t, preferred_element_type=jnp.float32)
            acc = part if acc is None else acc + part
    return acc                                        # (Cout, HW) f32


# --------------------------------------------------------------------------
# fused block1: GroupNorm -> Mish -> Conv3x3 (+bias)
# --------------------------------------------------------------------------
def _block1_kernel(x_ref, gmat_ref, g_ref, b_ref, w_ref, cb_ref, o_ref, *, W):
    x = x_ref[...]                                    # (Cin, HW)
    a = _mish(_group_norm(x, gmat_ref[...], g_ref[...], b_ref[...]))
    o_ref[...] = _conv3x3(a, w_ref, W) + cb_ref[...]


def block1_apply(x, gamma, beta, w, b, groups, H, W):
    N, Cin, HW = x.shape
    Cout = w.shape[0]
    w9 = w.reshape(Cout, Cin, 9).transpose(2, 0, 1)   # (9, Cout, Cin)
    gmat = _group_mat(Cin, groups, HW)
    kern = functools.partial(_block1_kernel, W=W)
    return pl.pallas_call(
        kern,
        out_shape=jax.ShapeDtypeStruct((N, Cout, HW), jnp.float32),
        grid=(N,),
        in_specs=[
            pl.BlockSpec((None, Cin, HW), lambda n: (n, 0, 0)),
            pl.BlockSpec((Cin, Cin), lambda n: (0, 0)),
            pl.BlockSpec((Cin, 1), lambda n: (0, 0)),
            pl.BlockSpec((Cin, 1), lambda n: (0, 0)),
            pl.BlockSpec((9, Cout, Cin), lambda n: (0, 0, 0)),
            pl.BlockSpec((Cout, 1), lambda n: (0, 0)),
        ],
        out_specs=pl.BlockSpec((None, Cout, HW), lambda n: (n, 0, 0)),
        compiler_params=pltpu.CompilerParams(dimension_semantics=("parallel",)),
    )(x, gmat, gamma.reshape(Cin, 1), beta.reshape(Cin, 1), w9,
      b.reshape(Cout, 1))


# --------------------------------------------------------------------------
# fused block2: (+temb bias) GroupNorm -> Mish -> Conv3x3 (+bias)
#               + res_conv(original x) (+res bias)
# --------------------------------------------------------------------------
def _block2_kernel(h_ref, temb_ref, gmat_ref, g_ref, be_ref, w_ref, cb_ref,
                   x_ref, rw_ref, rb_ref, o_ref, *, W):
    h = h_ref[...] + temb_ref[...]                    # (C, HW) + (C, 1)
    a = _mish(_group_norm(h, gmat_ref[...], g_ref[...], be_ref[...]))
    y = _conv3x3(a, w_ref, W) + cb_ref[...]
    # residual 1x1 conv on the ORIGINAL input, fused (no extra HBM pass)
    xr = x_ref[...].astype(jnp.bfloat16)
    res = jnp.dot(rw_ref[...].astype(jnp.bfloat16), xr,
                  preferred_element_type=jnp.float32)
    o_ref[...] = y + res + rb_ref[...]


def block2_apply(h, temb, gamma, beta, w, b, x, res_w, res_b, groups, H, W):
    N, C, HW = h.shape
    Cin = x.shape[1]
    Cout = w.shape[0]
    w9 = w.reshape(Cout, C, 9).transpose(2, 0, 1)     # (9, Cout, C)
    gmat = _group_mat(C, groups, HW)
    kern = functools.partial(_block2_kernel, W=W)
    return pl.pallas_call(
        kern,
        out_shape=jax.ShapeDtypeStruct((N, Cout, HW), jnp.float32),
        grid=(N,),
        in_specs=[
            pl.BlockSpec((None, C, HW), lambda n: (n, 0, 0)),
            pl.BlockSpec((None, C, 1), lambda n: (n, 0, 0)),
            pl.BlockSpec((C, C), lambda n: (0, 0)),
            pl.BlockSpec((C, 1), lambda n: (0, 0)),
            pl.BlockSpec((C, 1), lambda n: (0, 0)),
            pl.BlockSpec((9, Cout, C), lambda n: (0, 0, 0)),
            pl.BlockSpec((Cout, 1), lambda n: (0, 0)),
            pl.BlockSpec((None, Cin, HW), lambda n: (n, 0, 0)),
            pl.BlockSpec((Cout, Cin), lambda n: (0, 0)),
            pl.BlockSpec((Cout, 1), lambda n: (0, 0)),
        ],
        out_specs=pl.BlockSpec((None, Cout, HW), lambda n: (n, 0, 0)),
        compiler_params=pltpu.CompilerParams(dimension_semantics=("parallel",)),
    )(h, temb.reshape(N, C, 1), gmat, gamma.reshape(C, 1), beta.reshape(C, 1),
      w9, b.reshape(Cout, 1), x, res_w, res_b.reshape(Cout, 1))


# --------------------------------------------------------------------------
# fused SelfAtt: GroupNorm -> qkv 1x1 -> softmax(K over HW) -> both einsums
#                (per head) -> proj 1x1 (folded per head) + proj bias
# --------------------------------------------------------------------------
def _attn_kernel(y_ref, gmat_ref, g_ref, b_ref, wqkv_ref, wproj_ref, bproj_ref,
                 o_ref, *, num_heads):
    y = y_ref[...]                                    # (C, HW) f32
    a = _group_norm(y, gmat_ref[...], g_ref[...], b_ref[...])
    C, HW = a.shape
    d = C // num_heads
    qkv = jnp.dot(wqkv_ref[...].astype(jnp.bfloat16), a.astype(jnp.bfloat16),
                  preferred_element_type=jnp.float32)  # (3C, HW): [q; k; v]
    wproj = wproj_ref[...].astype(jnp.bfloat16)        # (C, C)
    acc = None
    for h in range(num_heads):                         # static, tiny head count
        q = qkv[h * d:(h + 1) * d, :]
        k = qkv[C + h * d:C + (h + 1) * d, :]
        v = qkv[2 * C + h * d:2 * C + (h + 1) * d, :]
        # softmax over HW (keys only, matches reference; no 1/sqrt(d) scaling)
        kmax = jnp.max(k, axis=-1, keepdims=True)
        ek = jnp.exp(k - kmax)
        ksum = jnp.sum(ek, axis=-1, keepdims=True)
        ksm = ek * pl.reciprocal(ksum, approx=True)
        # att^T[e, d'] = sum_n v[e, n] * ksm[d', n]
        attT = jax.lax.dot_general(
            v.astype(jnp.bfloat16), ksm.astype(jnp.bfloat16),
            (((1,), (1,)), ((), ())), preferred_element_type=jnp.float32)
        # out_h[e, n] = sum_d' att[d', e] * q[d', n]
        out_h = jnp.dot(attT.astype(jnp.bfloat16), q.astype(jnp.bfloat16),
                        preferred_element_type=jnp.float32)          # (d, HW)
        # fold this head's columns of the proj 1x1 conv
        c = jnp.dot(wproj[:, h * d:(h + 1) * d], out_h.astype(jnp.bfloat16),
                    preferred_element_type=jnp.float32)              # (C, HW)
        acc = c if acc is None else acc + c
    o_ref[...] = acc + bproj_ref[...]


def attn_apply(y, gamma, beta, wqkv, wproj, bproj, groups, num_heads):
    N, C, HW = y.shape
    gmat = _group_mat(C, groups, HW)
    kern = functools.partial(_attn_kernel, num_heads=num_heads)
    return pl.pallas_call(
        kern,
        out_shape=jax.ShapeDtypeStruct((N, C, HW), jnp.float32),
        grid=(N,),
        in_specs=[
            pl.BlockSpec((None, C, HW), lambda n: (n, 0, 0)),
            pl.BlockSpec((C, C), lambda n: (0, 0)),
            pl.BlockSpec((C, 1), lambda n: (0, 0)),
            pl.BlockSpec((C, 1), lambda n: (0, 0)),
            pl.BlockSpec((3 * C, C), lambda n: (0, 0)),
            pl.BlockSpec((C, C), lambda n: (0, 0)),
            pl.BlockSpec((C, 1), lambda n: (0, 0)),
        ],
        out_specs=pl.BlockSpec((None, C, HW), lambda n: (n, 0, 0)),
        compiler_params=pltpu.CompilerParams(dimension_semantics=("parallel",)),
    )(y, gmat, gamma.reshape(C, 1), beta.reshape(C, 1), wqkv, wproj,
      bproj.reshape(C, 1))


# --------------------------------------------------------------------------
# time-embedding MLP:  Mish -> Linear   (weight kept in torch (Dout, T) layout)
# --------------------------------------------------------------------------
def _mlp_kernel(t_ref, w_ref, b_ref, o_ref):
    t = _mish(t_ref[...])                             # (N, T) f32
    o_ref[...] = jax.lax.dot_general(
        t.astype(jnp.bfloat16), w_ref[...].astype(jnp.bfloat16),
        (((1,), (1,)), ((), ())),                     # contract T with T
        preferred_element_type=jnp.float32) + b_ref[...]


def mlp_apply(t, w, b):
    N, T = t.shape
    Dout = w.shape[0]
    return pl.pallas_call(
        _mlp_kernel,
        out_shape=jax.ShapeDtypeStruct((N, Dout), jnp.float32),
        grid=(1,),
        in_specs=[
            pl.BlockSpec((N, T), lambda i: (0, 0)),
            pl.BlockSpec((Dout, T), lambda i: (0, 0)),
            pl.BlockSpec((1, Dout), lambda i: (0, 0)),
        ],
        out_specs=pl.BlockSpec((N, Dout), lambda i: (0, 0)),
    )(t, w, b.reshape(1, Dout))


# --------------------------------------------------------------------------
# parameters + forward pass
# --------------------------------------------------------------------------
def _group_mat(C, groups, HW):
    # (C, C) matrix mixing per-channel sums into per-group means.
    cg = C // groups
    gid = jnp.arange(C, dtype=jnp.int32) // cg
    return (gid[:, None] == gid[None, :]).astype(jnp.float32) / float(cg * HW)


def init_params(key, dim, dim_out, time_emb_dim):
    ks = jax.random.split(key, 12)
    w = lambda k, s: 0.1 * jax.random.normal(k, s, jnp.float32)
    return {
        # mlp: Mish -> Linear(time_emb_dim, dim_out)
        "mlp_w": w(ks[0], (dim_out, time_emb_dim)),
        "mlp_b": w(ks[1], (dim_out,)),
        # block1
        "gn1_g": jnp.ones((dim,), jnp.float32),
        "gn1_b": jnp.zeros((dim,), jnp.float32),
        "conv1_w": w(ks[2], (dim_out, dim, 3, 3)),
        "conv1_b": w(ks[3], (dim_out,)),
        # block2
        "gn2_g": jnp.ones((dim_out,), jnp.float32),
        "gn2_b": jnp.zeros((dim_out,), jnp.float32),
        "conv2_w": w(ks[4], (dim_out, dim_out, 3, 3)),
        "conv2_b": w(ks[5], (dim_out,)),
        # residual 1x1 conv (dim != dim_out in this config)
        "res_w": w(ks[6], (dim_out, dim, 1, 1)),
        "res_b": w(ks[7], (dim_out,)),
        # SelfAtt
        "att_gn_g": jnp.ones((dim_out,), jnp.float32),
        "att_gn_b": jnp.zeros((dim_out,), jnp.float32),
        "qkv_w": w(ks[8], (3 * dim_out, dim_out, 1, 1)),   # bias=False
        "proj_w": w(ks[9], (dim_out, dim_out, 1, 1)),
        "proj_b": w(ks[10], (dim_out,)),
    }


def resblock_forward(x_nchw, time_emb, p, *, norm_groups, num_heads):
    N, Cin, H, W = x_nchw.shape
    HW = H * W
    dim_out = p["conv1_w"].shape[0]
    x = x_nchw.reshape(N, Cin, HW).astype(jnp.float32)

    # block1: GN -> Mish -> Conv3x3 (fully fused, conv via shifted matmuls)
    h = block1_apply(x, p["gn1_g"], p["gn1_b"], p["conv1_w"], p["conv1_b"],
                     norm_groups, H, W)

    # time-emb MLP (added as a per-channel bias inside the fused block2)
    temb = mlp_apply(time_emb, p["mlp_w"], p["mlp_b"])          # (N, dim_out)

    # block2: (+temb) GN -> Mish -> Conv3x3  + res_conv(x) fused
    # TODO(synk): nn.Dropout with p=0 is Identity, so it is omitted.
    y = block2_apply(h, temb, p["gn2_g"], p["gn2_b"], p["conv2_w"],
                     p["conv2_b"], x, p["res_w"].reshape(dim_out, Cin),
                     p["res_b"], norm_groups, H, W)

    # SelfAtt: GN -> qkv -> softmax(K) -> einsums -> proj, one fused kernel
    out = attn_apply(y, p["att_gn_g"], p["att_gn_b"],
                     p["qkv_w"].reshape(3 * dim_out, dim_out),
                     p["proj_w"].reshape(dim_out, dim_out),
                     p["proj_b"], norm_groups, num_heads)
    return out.reshape(N, dim_out, H, W)


# --------------------------------------------------------------------------
if __name__ == "__main__":
    N, dim, dim_out, H, W = 2, 4, 8, 16, 16
    time_emb_dim, norm_groups, num_heads = 8, 4, 2

    key = jax.random.PRNGKey(0)
    kx, kt = jax.random.split(key)
    x = jax.random.normal(kx, (N, dim, H, W), jnp.float32)
    t_emb = jax.random.normal(kt, (N, time_emb_dim), jnp.float32)

    params = init_params(jax.random.PRNGKey(42), dim, dim_out, time_emb_dim)

    out = resblock_forward(x, t_emb, params, norm_groups=norm_groups,
                           num_heads=num_heads)
    out = jax.block_until_ready(out)

    assert out.shape == (N, dim_out, H, W), out.shape
    assert bool(jnp.isfinite(out).all())
    print("KERNEL_OK")
</pallas_src>

<mosaic_0001>
module attributes {stable_mosaic.version = 11 : i64} {
  func.func @_block1_kernel(%arg0: i32, %arg1: memref<1x4x256xf32, #tpu.memory_space<vmem>>, %arg2: memref<4x4xf32, #tpu.memory_space<vmem>>, %arg3: memref<4x1xf32, #tpu.memory_space<vmem>>, %arg4: memref<4x1xf32, #tpu.memory_space<vmem>>, %arg5: memref<9x8x4xf32, #tpu.memory_space<vmem>>, %arg6: memref<8x1xf32, #tpu.memory_space<vmem>>, %arg7: memref<1x8x256xf32, #tpu.memory_space<vmem>>) attributes {dimension_semantics = [#tpu.dimension_semantics<parallel>], iteration_bounds = array<i64: 2>, scalar_prefetch = 0 : i64, scratch_operands = 0 : i64, tpu.core_type = #tpu.core_type<tc>, window_params = [{transform_indices = @transform_0, window_bounds = array<i64: 1, 4, 256>}, {pipeline_mode = #tpu.pipeline_mode<synchronous>, transform_indices = @transform_1, window_bounds = array<i64: 4, 4>}, {pipeline_mode = #tpu.pipeline_mode<synchronous>, transform_indices = @transform_2, window_bounds = array<i64: 4, 1>}, {pipeline_mode = #tpu.pipeline_mode<synchronous>, transform_indices = @transform_3, window_bounds = array<i64: 4, 1>}, {pipeline_mode = #tpu.pipeline_mode<synchronous>, transform_indices = @transform_4, window_bounds = array<i64: 9, 8, 4>}, {pipeline_mode = #tpu.pipeline_mode<synchronous>, transform_indices = @transform_5, window_bounds = array<i64: 8, 1>}, {transform_indices = @transform_6, window_bounds = array<i64: 1, 8, 256>}]} {
    %c0 = arith.constant 0 : index
    %c0_0 = arith.constant 0 : index
    %c0_1 = arith.constant 0 : index
    %0 = vector.load %arg1[%c0, %c0_0, %c0_1] : memref<1x4x256xf32, #tpu.memory_space<vmem>>, vector<1x4x256xf32>
    %1 = vector.shape_cast %0 : vector<1x4x256xf32> to vector<4x256xf32>
    %c0_2 = arith.constant 0 : index
    %c0_3 = arith.constant 0 : index
    %2 = vector.load %arg2[%c0_2, %c0_3] : memref<4x4xf32, #tpu.memory_space<vmem>>, vector<4x4xf32>
    %c0_4 = arith.constant 0 : index
    %c0_5 = arith.constant 0 : index
    %3 = vector.load %arg3[%c0_4, %c0_5] : memref<4x1xf32, #tpu.memory_space<vmem>>, vector<4x1xf32>
    %c0_6 = arith.constant 0 : index
    %c0_7 = arith.constant 0 : index
    %4 = vector.load %arg4[%c0_6, %c0_7] : memref<4x1xf32, #tpu.memory_space<vmem>>, vector<4x1xf32>
    %cst = arith.constant dense<0.000000e+00> : vector<4xf32>
    %5 = vector.multi_reduction <add>, %1, %cst [1] : vector<4x256xf32> to vector<4xf32>
    %6 = vector.shape_cast %5 : vector<4xf32> to vector<4x1xf32>
    %7 = arith.mulf %1, %1 : vector<4x256xf32>
    %cst_8 = arith.constant dense<0.000000e+00> : vector<4xf32>
    %8 = vector.multi_reduction <add>, %7, %cst_8 [1] : vector<4x256xf32> to vector<4xf32>
    %9 = vector.shape_cast %8 : vector<4xf32> to vector<4x1xf32>
    %cst_9 = arith.constant dense<0.000000e+00> : vector<4x1xf32>
    %10 = tpu.matmul %2, %6, %cst_9 {dimension_numbers = #tpu.dot_dimension_numbers<[1], [0], [0], [1], [0, 0, 1, 1], [], []>} : vector<4x4xf32>, vector<4x1xf32>, vector<4x1xf32> -> vector<4x1xf32>
    %cst_10 = arith.constant dense<0.000000e+00> : vector<4x1xf32>
    %11 = tpu.matmul %2, %9, %cst_10 {dimension_numbers = #tpu.dot_dimension_numbers<[1], [0], [0], [1], [0, 0, 1, 1], [], []>} : vector<4x4xf32>, vector<4x1xf32>, vector<4x1xf32> -> vector<4x1xf32>
    %12 = arith.mulf %10, %10 : vector<4x1xf32>
    %13 = arith.subf %11, %12 : vector<4x1xf32>
    %14 = vector.broadcast %10 : vector<4x1xf32> to vector<4x256xf32>
    %15 = arith.subf %1, %14 : vector<4x256xf32>
    %cst_11 = arith.constant 9.99999974E-6 : f32
    %16 = vector.broadcast %cst_11 : f32 to vector<4x1xf32>
    %17 = arith.addf %13, %16 : vector<4x1xf32>
    %18 = math.rsqrt %17 : vector<4x1xf32>
    %19 = vector.broadcast %18 : vector<4x1xf32> to vector<4x256xf32>
    %20 = arith.mulf %15, %19 : vector<4x256xf32>
    %21 = vector.broadcast %3 : vector<4x1xf32> to vector<4x256xf32>
    %22 = arith.mulf %20, %21 : vector<4x256xf32>
    %23 = vector.broadcast %4 : vector<4x1xf32> to vector<4x256xf32>
    %24 = arith.addf %22, %23 : vector<4x256xf32>
    %cst_12 = arith.constant 2.000000e+01 : f32
    %25 = vector.broadcast %cst_12 : f32 to vector<4x256xf32>
    %26 = arith.cmpf ogt, %24, %25 : vector<4x256xf32>
    %cst_13 = arith.constant 2.000000e+01 : f32
    %27 = vector.broadcast %cst_13 : f32 to vector<4x256xf32>
    %28 = arith.minimumf %24, %27 : vector<4x256xf32>
    %29 = math.exp %28 : vector<4x256xf32>
    %30 = math.log1p %29 : vector<4x256xf32>
    %31 = arith.select %26, %24, %30 : vector<4x256xi1>, vector<4x256xf32>
    %32 = math.tanh %31 : vector<4x256xf32>
    %33 = arith.mulf %24, %32 : vector<4x256xf32>
    %34 = tpu.iota {dimensions = array<i32: 1>} : vector<1x256xi32>
    %c16_i32 = arith.constant 16 : i32
    %c0_i32 = arith.constant 0 : i32
    %35 = arith.cmpi eq, %c16_i32, %c0_i32 : i32
    %c1_i32 = arith.constant 1 : i32
    %36 = arith.select %35, %c1_i32, %c16_i32 : i32
    %37 = vector.broadcast %36 : i32 to vector<1x256xi32>
    %38 = arith.remsi %34, %37 : vector<1x256xi32>
    %c0_i32_14 = arith.constant 0 : i32
    %39 = vector.broadcast %c0_i32_14 : i32 to vector<1x256xi32>
    %40 = arith.cmpi ne, %38, %39 : vector<1x256xi32>
    %c0_i32_15 = arith.constant 0 : i32
    %41 = vector.broadcast %c0_i32_15 : i32 to vector<1x256xi32>
    %42 = arith.cmpi slt, %38, %41 : vector<1x256xi32>
    %c0_i32_16 = arith.constant 0 : i32
    %43 = arith.cmpi slt, %36, %c0_i32_16 : i32
    %44 = vector.broadcast %43 : i1 to vector<1x256xi1>
    %45 = vector.broadcast %44 : vector<1x256xi1> to vector<1x256xi1>
    %46 = arith.xori %42, %45 : vector<1x256xi1>
    %47 = arith.andi %46, %40 : vector<1x256xi1>
    %48 = vector.broadcast %36 : i32 to vector<1x256xi32>
    %49 = arith.addi %38, %48 : vector<1x256xi32>
    %50 = arith.select %47, %49, %38 : vector<1x256xi1>, vector<1x256xi32>
    %51 = arith.truncf %33 : vector<4x256xf32> to vector<4x256xbf16>
    %cst_17 = arith.constant 0.000000e+00 : bf16
    %52 = vector.broadcast %cst_17 : bf16 to vector<4x17xbf16>
    %53 = vector.extract_strided_slice %51 {offsets = [0, 0], sizes = [4, 239], strides = [1, 1]} : vector<4x256xbf16> to vector<4x239xbf16>
    %54 = tpu.concatenate %52, %53 in 1 : vector<4x17xbf16>, vector<4x239xbf16> -> vector<4x256xbf16>
    %c1_i32_18 = arith.constant 1 : i32
    %55 = vector.broadcast %c1_i32_18 : i32 to vector<1x256xi32>
    %56 = arith.cmpi sge, %50, %55 : vector<1x256xi32>
    %cst_19 = arith.constant 0.000000e+00 : bf16
    %57 = vector.broadcast %cst_19 : bf16 to vector<4x256xbf16>
    %58 = vector.shape_cast %56 : vector<1x256xi1> to vector<1x256xi1>
    %59 = vector.broadcast %58 : vector<1x256xi1> to vector<4x256xi1>
    %60 = arith.select %59, %54, %57 : vector<4x256xi1>, vector<4x256xbf16>
    %c0_20 = arith.constant 0 : index
    %c0_21 = arith.constant 0 : index
    %c0_22 = arith.constant 0 : index
    %61 = vector.load %arg5[%c0_20, %c0_21, %c0_22] : memref<9x8x4xf32, #tpu.memory_space<vmem>>, vector<1x8x4xf32>
    %62 = vector.shape_cast %61 : vector<1x8x4xf32> to vector<8x4xf32>
    %63 = arith.truncf %62 : vector<8x4xf32> to vector<8x4xbf16>
    %cst_23 = arith.constant dense<0.000000e+00> : vector<8x256xf32>
    %64 = tpu.matmul %63, %60, %cst_23 {dimension_numbers = #tpu.dot_dimension_numbers<[1], [0], [0], [1], [0, 0, 1, 1], [], []>} : vector<8x4xbf16>, vector<4x256xbf16>, vector<8x256xf32> -> vector<8x256xf32>
    %cst_24 = arith.constant 0.000000e+00 : bf16
    %65 = vector.broadcast %cst_24 : bf16 to vector<4x16xbf16>
    %66 = vector.extract_strided_slice %51 {offsets = [0, 0], sizes = [4, 240], strides = [1, 1]} : vector<4x256xbf16> to vector<4x240xbf16>
    %67 = tpu.concatenate %65, %66 in 1 : vector<4x16xbf16>, vector<4x240xbf16> -> vector<4x256xbf16>
    %c1 = arith.constant 1 : index
    %c0_25 = arith.constant 0 : index
    %c0_26 = arith.constant 0 : index
    %68 = vector.load %arg5[%c1, %c0_25, %c0_26] : memref<9x8x4xf32, #tpu.memory_space<vmem>>, vector<1x8x4xf32>
    %69 = vector.shape_cast %68 : vector<1x8x4xf32> to vector<8x4xf32>
    %70 = arith.truncf %69 : vector<8x4xf32> to vector<8x4xbf16>
    %cst_27 = arith.constant dense<0.000000e+00> : vector<8x256xf32>
    %71 = tpu.matmul %70, %67, %cst_27 {dimension_numbers = #tpu.dot_dimension_numbers<[1], [0], [0], [1], [0, 0, 1, 1], [], []>} : vector<8x4xbf16>, vector<4x256xbf16>, vector<8x256xf32> -> vector<8x256xf32>
    %72 = arith.addf %64, %71 : vector<8x256xf32>
    %cst_28 = arith.constant 0.000000e+00 : bf16
    %73 = vector.broadcast %cst_28 : bf16 to vector<4x15xbf16>
    %74 = vector.extract_strided_slice %51 {offsets = [0, 0], sizes = [4, 241], strides = [1, 1]} : vector<4x256xbf16> to vector<4x241xbf16>
    %75 = tpu.concatenate %73, %74 in 1 : vector<4x15xbf16>, vector<4x241xbf16> -> vector<4x256xbf16>
    %c14_i32 = arith.constant 14 : i32
    %76 = vector.broadcast %c14_i32 : i32 to vector<1x256xi32>
    %77 = arith.cmpi sle, %50, %76 : vector<1x256xi32>
    %cst_29 = arith.constant 0.000000e+00 : bf16
    %78 = vector.broadcast %cst_29 : bf16 to vector<4x256xbf16>
    %79 = vector.shape_cast %77 : vector<1x256xi1> to vector<1x256xi1>
    %80 = vector.broadcast %79 : vector<1x256xi1> to vector<4x256xi1>
    %81 = arith.select %80, %75, %78 : vector<4x256xi1>, vector<4x256xbf16>
    %c2 = arith.constant 2 : index
    %c0_30 = arith.constant 0 : index
    %c0_31 = arith.constant 0 : index
    %82 = vector.load %arg5[%c2, %c0_30, %c0_31] : memref<9x8x4xf32, #tpu.memory_space<vmem>>, vector<1x8x4xf32>
    %83 = vector.shape_cast %82 : vector<1x8x4xf32> to vector<8x4xf32>
    %84 = arith.truncf %83 : vector<8x4xf32> to vector<8x4xbf16>
    %cst_32 = arith.constant dense<0.000000e+00> : vector<8x256xf32>
    %85 = tpu.matmul %84, %81, %cst_32 {dimension_numbers = #tpu.dot_dimension_numbers<[1], [0], [0], [1], [0, 0, 1, 1], [], []>} : vector<8x4xbf16>, vector<4x256xbf16>, vector<8x256xf32> -> vector<8x256xf32>
    %86 = arith.addf %72, %85 : vector<8x256xf32>
    %cst_33 = arith.constant 0.000000e+00 : bf16
    %87 = vector.broadcast %cst_33 : bf16 to vector<4x1xbf16>
    %88 = vector.extract_strided_slice %51 {offsets = [0, 0], sizes = [4, 255], strides = [1, 1]} : vector<4x256xbf16> to vector<4x255xbf16>
    %89 = tpu.concatenate %87, %88 in 1 : vector<4x1xbf16>, vector<4x255xbf16> -> vector<4x256xbf16>
    %c1_i32_34 = arith.constant 1 : i32
    %90 = vector.broadcast %c1_i32_34 : i32 to vector<1x256xi32>
    %91 = arith.cmpi sge, %50, %90 : vector<1x256xi32>
    %cst_35 = arith.constant 0.000000e+00 : bf16
    %92 = vector.broadcast %cst_35 : bf16 to vector<4x256xbf16>
    %93 = vector.shape_cast %91 : vector<1x256xi1> to vector<1x256xi1>
    %94 = vector.broadcast %93 : vector<1x256xi1> to vector<4x256xi1>
    %95 = arith.select %94, %89, %92 : vector<4x256xi1>, vector<4x256xbf16>
    %c3 = arith.constant 3 : index
    %c0_36 = arith.constant 0 : index
    %c0_37 = arith.constant 0 : index
    %96 = vector.load %arg5[%c3, %c0_36, %c0_37] : memref<9x8x4xf32, #tpu.memory_space<vmem>>, vector<1x8x4xf32>
    %97 = vector.shape_cast %96 : vector<1x8x4xf32> to vector<8x4xf32>
    %98 = arith.truncf %97 : vector<8x4xf32> to vector<8x4xbf16>
    %cst_38 = arith.constant dense<0.000000e+00> : vector<8x256xf32>
    %99 = tpu.matmul %98, %95, %cst_38 {dimension_numbers = #tpu.dot_dimension_numbers<[1], [0], [0], [1], [0, 0, 1, 1], [], []>} : vector<8x4xbf16>, vector<4x256xbf16>, vector<8x256xf32> -> vector<8x256xf32>
    %100 = arith.addf %86, %99 : vector<8x256xf32>
    %c4 = arith.constant 4 : index
    %c0_39 = arith.constant 0 : index
    %c0_40 = arith.constant 0 : index
    %101 = vector.load %arg5[%c4, %c0_39, %c0_40] : memref<9x8x4xf32, #tpu.memory_space<vmem>>, vector<1x8x4xf32>
    %102 = vector.shape_cast %101 : vector<1x8x4xf32> to vector<8x4xf32>
    %103 = arith.truncf %102 : vector<8x4xf32> to vector<8x4xbf16>
    %cst_41 = arith.constant dense<0.000000e+00> : vector<8x256xf32>
    %104 = tpu.matmul %103, %51, %cst_41 {dimension_numbers = #tpu.dot_dimension_numbers<[1], [0], [0], [1], [0, 0, 1, 1], [], []>} : vector<8x4xbf16>, vector<4x256xbf16>, vector<8x256xf32> -> vector<8x256xf32>
    %105 = arith.addf %100, %104 : vector<8x256xf32>
    %106 = vector.extract_strided_slice %51 {offsets = [0, 1], sizes = [4, 255], strides = [1, 1]} : vector<4x256xbf16> to vector<4x255xbf16>
    %cst_42 = arith.constant 0.000000e+00 : bf16
    %107 = vector.broadcast %cst_42 : bf16 to vector<4x1xbf16>
    %108 = tpu.concatenate %106, %107 in 1 : vector<4x255xbf16>, vector<4x1xbf16> -> vector<4x256xbf16>
    %c14_i32_43 = arith.constant 14 : i32
    %109 = vector.broadcast %c14_i32_43 : i32 to vector<1x256xi32>
    %110 = arith.cmpi sle, %50, %109 : vector<1x256xi32>
    %cst_44 = arith.constant 0.000000e+00 : bf16
    %111 = vector.broadcast %cst_44 : bf16 to vector<4x256xbf16>
    %112 = vector.shape_cast %110 : vector<1x256xi1> to vector<1x256xi1>
    %113 = vector.broadcast %112 : vector<1x256xi1> to vector<4x256xi1>
    %114 = arith.select %113, %108, %111 : vector<4x256xi1>, vector<4x256xbf16>
    %c5 = arith.constant 5 : index
    %c0_45 = arith.constant 0 : index
    %c0_46 = arith.constant 0 : index
    %115 = vector.load %arg5[%c5, %c0_45, %c0_46] : memref<9x8x4xf32, #tpu.memory_space<vmem>>, vector<1x8x4xf32>
    %116 = vector.shape_cast %115 : vector<1x8x4xf32> to vector<8x4xf32>
    %117 = arith.truncf %116 : vector<8x4xf32> to vector<8x4xbf16>
    %cst_47 = arith.constant dense<0.000000e+00> : vector<8x256xf32>
    %118 = tpu.matmul %117, %114, %cst_47 {dimension_numbers = #tpu.dot_dimension_numbers<[1], [0], [0], [1], [0, 0, 1, 1], [], []>} : vector<8x4xbf16>, vector<4x256xbf16>, vector<8x256xf32> -> vector<8x256xf32>
    %119 = arith.addf %105, %118 : vector<8x256xf32>
    %120 = vector.extract_strided_slice %51 {offsets = [0, 15], sizes = [4, 241], strides = [1, 1]} : vector<4x256xbf16> to vector<4x241xbf16>
    %cst_48 = arith.constant 0.000000e+00 : bf16
    %121 = vector.broadcast %cst_48 : bf16 to vector<4x15xbf16>
    %122 = tpu.concatenate %120, %121 in 1 : vector<4x241xbf16>, vector<4x15xbf16> -> vector<4x256xbf16>
    %c1_i32_49 = arith.constant 1 : i32
    %123 = vector.broadcast %c1_i32_49 : i32 to vector<1x256xi32>
    %124 = arith.cmpi sge, %50, %123 : vector<1x256xi32>
    %cst_50 = arith.constant 0.000000e+00 : bf16
    %125 = vector.broadcast %cst_50 : bf16 to vector<4x256xbf16>
    %126 = vector.shape_cast %124 : vector<1x256xi1> to vector<1x256xi1>
    %127 = vector.broadcast %126 : vector<1x256xi1> to vector<4x256xi1>
    %128 = arith.select %127, %122, %125 : vector<4x256xi1>, vector<4x256xbf16>
    %c6 = arith.constant 6 : index
    %c0_51 = arith.constant 0 : index
    %c0_52 = arith.constant 0 : index
    %129 = vector.load %arg5[%c6, %c0_51, %c0_52] : memref<9x8x4xf32, #tpu.memory_space<vmem>>, vector<1x8x4xf32>
    %130 = vector.shape_cast %129 : vector<1x8x4xf32> to vector<8x4xf32>
    %131 = arith.truncf %130 : vector<8x4xf32> to vector<8x4xbf16>
    %cst_53 = arith.constant dense<0.000000e+00> : vector<8x256xf32>
    %132 = tpu.matmul %131, %128, %cst_53 {dimension_numbers = #tpu.dot_dimension_numbers<[1], [0], [0], [1], [0, 0, 1, 1], [], []>} : vector<8x4xbf16>, vector<4x256xbf16>, vector<8x256xf32> -> vector<8x256xf32>
    %133 = arith.addf %119, %132 : vector<8x256xf32>
    %134 = vector.extract_strided_slice %51 {offsets = [0, 16], sizes = [4, 240], strides = [1, 1]} : vector<4x256xbf16> to vector<4x240xbf16>
    %cst_54 = arith.constant 0.000000e+00 : bf16
    %135 = vector.broadcast %cst_54 : bf16 to vector<4x16xbf16>
    %136 = tpu.concatenate %134, %135 in 1 : vector<4x240xbf16>, vector<4x16xbf16> -> vector<4x256xbf16>
    %c7 = arith.constant 7 : index
    %c0_55 = arith.constant 0 : index
    %c0_56 = arith.constant 0 : index
    %137 = vector.load %arg5[%c7, %c0_55, %c0_56] : memref<9x8x4xf32, #tpu.memory_space<vmem>>, vector<1x8x4xf32>
    %138 = vector.shape_cast %137 : vector<1x8x4xf32> to vector<8x4xf32>
    %139 = arith.truncf %138 : vector<8x4xf32> to vector<8x4xbf16>
    %cst_57 = arith.constant dense<0.000000e+00> : vector<8x256xf32>
    %140 = tpu.matmul %139, %136, %cst_57 {dimension_numbers = #tpu.dot_dimension_numbers<[1], [0], [0], [1], [0, 0, 1, 1], [], []>} : vector<8x4xbf16>, vector<4x256xbf16>, vector<8x256xf32> -> vector<8x256xf32>
    %141 = arith.addf %133, %140 : vector<8x256xf32>
    %142 = vector.extract_strided_slice %51 {offsets = [0, 17], sizes = [4, 239], strides = [1, 1]} : vector<4x256xbf16> to vector<4x239xbf16>
    %cst_58 = arith.constant 0.000000e+00 : bf16
    %143 = vector.broadcast %cst_58 : bf16 to vector<4x17xbf16>
    %144 = tpu.concatenate %142, %143 in 1 : vector<4x239xbf16>, vector<4x17xbf16> -> vector<4x256xbf16>
    %c14_i32_59 = arith.constant 14 : i32
    %145 = vector.broadcast %c14_i32_59 : i32 to vector<1x256xi32>
    %146 = arith.cmpi sle, %50, %145 : vector<1x256xi32>
    %cst_60 = arith.constant 0.000000e+00 : bf16
    %147 = vector.broadcast %cst_60 : bf16 to vector<4x256xbf16>
    %148 = vector.shape_cast %146 : vector<1x256xi1> to vector<1x256xi1>
    %149 = vector.broadcast %148 : vector<1x256xi1> to vector<4x256xi1>
    %150 = arith.select %149, %144, %147 : vector<4x256xi1>, vector<4x256xbf16>
    %c8 = arith.constant 8 : index
    %c0_61 = arith.constant 0 : index
    %c0_62 = arith.constant 0 : index
    %151 = vector.load %arg5[%c8, %c0_61, %c0_62] : memref<9x8x4xf32, #tpu.memory_space<vmem>>, vector<1x8x4xf32>
    %152 = vector.shape_cast %151 : vector<1x8x4xf32> to vector<8x4xf32>
    %153 = arith.truncf %152 : vector<8x4xf32> to vector<8x4xbf16>
    %cst_63 = arith.constant dense<0.000000e+00> : vector<8x256xf32>
    %154 = tpu.matmul %153, %150, %cst_63 {dimension_numbers = #tpu.dot_dimension_numbers<[1], [0], [0], [1], [0, 0, 1, 1], [], []>} : vector<8x4xbf16>, vector<4x256xbf16>, vector<8x256xf32> -> vector<8x256xf32>
    %155 = arith.addf %141, %154 : vector<8x256xf32>
    %c0_64 = arith.constant 0 : index
    %c0_65 = arith.constant 0 : index
    %156 = vector.load %arg6[%c0_64, %c0_65] : memref<8x1xf32, #tpu.memory_space<vmem>>, vector<8x1xf32>
    %157 = vector.broadcast %156 : vector<8x1xf32> to vector<8x256xf32>
    %158 = arith.addf %155, %157 : vector<8x256xf32>
    %c0_66 = arith.constant 0 : index
    %c0_67 = arith.constant 0 : index
    %c0_68 = arith.constant 0 : index
    %159 = vector.load %arg7[%c0_66, %c0_67, %c0_68] : memref<1x8x256xf32, #tpu.memory_space<vmem>>, vector<1x8x256xf32>
    %160 = vector.shape_cast %159 : vector<1x8x256xf32> to vector<8x256xf32>
    %161 = vector.shape_cast %158 : vector<8x256xf32> to vector<1x8x256xf32>
    tpu.vector_store %arg7[%c0_66, %c0_67, %c0_68], %161 {strides = array<i32>} : memref<1x8x256xf32, #tpu.memory_space<vmem>>, vector<1x8x256xf32>,
    return
  }
  func.func @transform_0(%arg0: i32) -> (i32, i32, i32) {
    %c0_i32 = arith.constant 0 : i32
    %c0_i32_0 = arith.constant 0 : i32
    %c0_i32_1 = arith.constant 0 : i32
    return %arg0, %c0_i32, %c0_i32_0 : i32, i32, i32
  }
  func.func @transform_1(%arg0: i32) -> (i32, i32) {
    %c0_i32 = arith.constant 0 : i32
    %c0_i32_0 = arith.constant 0 : i32
    %c0_i32_1 = arith.constant 0 : i32
    return %c0_i32, %c0_i32_0 : i32, i32
  }
  func.func @transform_2(%arg0: i32) -> (i32, i32) {
    %c0_i32 = arith.constant 0 : i32
    %c0_i32_0 = arith.constant 0 : i32
    %c0_i32_1 = arith.constant 0 : i32
    return %c0_i32, %c0_i32_0 : i32, i32
  }
  func.func @transform_3(%arg0: i32) -> (i32, i32) {
    %c0_i32 = arith.constant 0 : i32
    %c0_i32_0 = arith.constant 0 : i32
    %c0_i32_1 = arith.constant 0 : i32
    return %c0_i32, %c0_i32_0 : i32, i32
  }
  func.func @transform_4(%arg0: i32) -> (i32, i32, i32) {
    %c0_i32 = arith.constant 0 : i32
    %c0_i32_0 = arith.constant 0 : i32
    %c0_i32_1 = arith.constant 0 : i32
    %c0_i32_2 = arith.constant 0 : i32
    return %c0_i32, %c0_i32_0, %c0_i32_1 : i32, i32, i32
  }
  func.func @transform_5(%arg0: i32) -> (i32, i32) {
    %c0_i32 = arith.constant 0 : i32
    %c0_i32_0 = arith.constant 0 : i32
    %c0_i32_1 = arith.constant 0 : i32
    return %c0_i32, %c0_i32_0 : i32, i32
  }
  func.func @transform_6(%arg0: i32) -> (i32, i32, i32) {
    %c0_i32 = arith.constant 0 : i32
    %c0_i32_0 = arith.constant 0 : i32
    %c0_i32_1 = arith.constant 0 : i32
    return %arg0, %c0_i32, %c0_i32_0 : i32, i32, i32
  }
}

</mosaic_0001>

<bundles_post_ra>
// kernel: tpu_custom_call.1
= control target key start
LH: loop header
LB: loop body
LE: loop exit
PB: predicated region body
PF: predicated region fallthrough
CT: control target
= control target key end

     0   :  { %11 = vsyncpa [#allocation3], 0  ;;  %s1722_s0 = inlined_call_operand.vmem [shape: f32[2,4,256], index: 0, kind: input, shape index: {}]   ;;  %s1723_s1 = inlined_call_operand.vmem [shape: f32[4,4], index: 1, kind: input, shape index: {}]   ;;  %s1724_s2 = inlined_call_operand.vmem [shape: f32[4,1], index: 2, kind: input, shape index: {}]   ;;  %s1725_s3 = inlined_call_operand.vmem [shape: f32[4,1], index: 3, kind: input, shape index: {}]   ;;  %s1726_s4 = inlined_call_operand.vmem [shape: f32[9,8,4], index: 4, kind: input, shape index: {}]   ;;  %s1727_s5 = inlined_call_operand.vmem [shape: f32[8,1], index: 5, kind: input, shape index: {}]   ;;  %s1728_s6 = inlined_call_operand.hbm [shape: f32[2,8,256], index: 6, kind: output, shape index: {}]  }
   0x1   :  { %13 = vsyncpa [#allocation3 + $0x1], 0  ;;  %s1467_s21 = smov 0   ;;  %s1469_s22 = smov 0  }
   0x2   :  { %s1471_s23 = smov 0   ;;  %s1473_s24 = smov 0  }
   0x3 LB: > { %s1488_s25 = sadd.s32 4294967295, %s1417_s24   ;;  %s1237_s26 = sadd.s32 4294967294, %s1417_s24   ;;  %s1417_s24 = sphi %s1473_s24, %s1734_s24   ;;  %s1413_s23 = sphi %s1471_s23, %s1733_s23   ;;  %s1409_s22 = sphi %s1469_s22, %s1732_s22   ;;  %s1405_s21 = sphi %s1467_s21, %s1731_s21  }
   0x4   : > { %s1492_s27 = sadd.s32 1, %s1417_s24   ;;  %s157_s28 = sadd.s32 1, %s1413_s23 }
   0x5   : > { %s154_s29 = ssub.s32 %s1417_s24, %s1492_s27  ;;  %p167_p0 = scmp.ne.s32.totalorder %s1413_s23, %s1409_s22 }
   0x6   : > { %p155_p1 = scmp.eq.s32.totalorder %s154_s29, 0  ;;  %p168_p2 = scmp.eq.s32.totalorder %s1488_s25, 1 }
   0x7   : > { %p173_p3 = scmp.ne.s32.totalorder %s1409_s22, %s1405_s21  ;;  %p174_p4 = scmp.eq.s32.totalorder %s1237_s26, 1 }
   0x8   : > { %s1503_s30 = scalar_select %p155_p1, %s1413_s23, %s157_s28  }
   0x9   : > { %p1505_p5 = por %p168_p2, %p167_p0  ;;  %p1509_p6 = por %p174_p4, %p173_p3 }
   0xa   : > { %p1240_p7 = scmp.ge.s32.totalorder %s1417_s24, 1  ;;  %p215_p8 = scmp.lt.s32.totalorder %s1417_s24, 3 }
   0xc   : > { %p216_p9 = pnand %p1240_p7, %p215_p8 }
   0xd   : > { %p245_p10 = scmp.lt.s32.totalorder (!%p216_p9), %s1488_s25, 1  ;;  %s1423_s20 = smov (!%p216_p9), 113  }
   0xe   : > { %219 = sbr.rel (%p216_p9) target bundleno = 952 (0x3b8), region = 44  ;;  %s1424_s26 = smov (!%p216_p9), 16  }
   0xf   : > { %s1425_s28 = smov (!%p216_p9), 112   ;;  %s1426_s29 = smov (!%p216_p9), 17  }
  0x10   : > { %s1430_s14 = smov (!%p216_p9), 127   ;;  %s242_s18 = sand.u32 (!%p216_p9), 1, %s1409_s22  }
  0x11   : > { %s1241_s19 = sshll.u32 (!%p216_p9), %s242_s18, 4  ;;  %s1164_s11 = scalar_lea.sflag (!%p216_p9), [#allocation3], %s242_s18 }
  0x13   : > { %v1419_v0 = vmov 0.0   ;;  %s246_s9 = scalar_select %p245_p10, %s1488_s25, 1  ;;  %vm260_vm0 = vcmask 1043456   ;;  %vm1420_vm1 = vmmov 0   ;;  %v1421_v11 = vmov 0   ;;  %v1153_v58 = vld [vmem:[%s1727_s5] sm:$0xff] }
  0x14   : > { %1285 = vmatprep.subr.mxu1 %v1419_v0  ;;  %1287 = vmatprep.mubr.msk.f32.mxu1 %vm1420_vm1, %v1419_v0  ;;  %v254_v12 = vld [vmem:[%s1723_s1] sm:$0xf]  ;;  %vm275_vm2 = vcmask 31744   ;;  %v1422_v25 = vmov 839922192   ;;  %v434_v27 = vlaneseq  ;;  %vm569_vm11 = vcmask 130048  }
  0x15   : > { %s1279_s10 = sshll.u32 %s246_s9, 3  ;;  %1347 = vset.pattern.permute.xlu1 %v1421_v11  ;;  %1346 = vset.pattern.permute.xlu0 %v1421_v11  ;;  %v255_v15 = vld [vmem:[%s1724_s2] sm:$0xf]  ;;  %v432_v26 = vunpack.c.l.s4 %v1422_v25  ;;  %s1427_s9 = smov 111   ;;  %vm535_vm12 = vcmask 138240   ;;  %vm580_vm13 = vcmask 1041408  }
  0x16   : > { %s249_s13 = scalar_lea.vmem %s1722_s0, %s1279_s10  ;;  %618 = vmatprep.mubr.bf16.mxu0 %v1421_v11  ;;  %v256_v24 = vld [vmem:[%s1725_s3] sm:$0xf]  ;;  %v1542_v29 = vshrl.u32 %v434_v27, 7  ;;  %s1428_s10 = smov 15   ;;  %v498_v61 = vand.u32 127, %v434_v27  ;;  %vm681_vm15 = vcmask 121856  }
  0x17   : > { %v253_v1 = vld [vmem:[%s249_s13] sm:$0xff]  ;;  %v433_v28 = vunpack.c.0.s8 %v432_v26  ;;  %s1429_s13 = smov 1  }
  0x18   : > { %v258_v2 = vcombine.high %v253_v1, %v253_v1  ;;  %v261_v3 = vsel %vm260_vm0, %v253_v1, 0.0  ;;  %v266_v4 = vmul.f32 %v253_v1, %v253_v1  ;;  %v499_v62 = vadd.s32 128, %v498_v61 }
  0x19   : > { %v436_v30 = vsub.s32 %v433_v28, %v1542_v29 }
  0x1a   : > { %v262_v5 = vsel %vm260_vm0, %v258_v2, 0.0  ;;  %v268_v6 = vcombine.high %v266_v4, %v266_v4  ;;  %v270_v7 = vsel %vm260_vm0, %v266_v4, 0.0  ;;  %v553_v4 = vsub.s32 0, %v1542_v29 }
  0x1b   : > { %v263_v8 = vadd.f32 %v262_v5, %v261_v3 }
  0x1c   : > { %v271_v9 = vsel %vm260_vm0, %v268_v6, 0.0  ;;  %v557_v6 = vsub.s32 4, %v1542_v29 }
  0x1d   : > { %264 = vadd.xlane.f32.xlu0 %v263_v8  ;;  %v272_v10 = vadd.f32 %v271_v9, %v270_v7 }
  0x21   : > { %273 = vadd.xlane.f32.xlu0 %v272_v10 }
  0x37   : > { %457 = vperm.xlu0 %1346, %v255_v15  }
  0xa6   : > { %v265_v13 = vpop.xlane.xlu0 %264 }
  0xa7   : > { %1286 = vmatpush3.msk.msra.mxu1 %vm260_vm0, %v265_v13  ;;  %v1248_v13 = vld [vmem:[%s1726_s4 + $0x8] sm:$0xff] }
  0xa8   : > { %1288 = vmatmul.mubr.msk.f32.vlgmr.msra.gmra.mxu1 %vm275_vm2, %v254_v12  ;;  %1290 = vmatprep.subr.mxu1 %v1419_v0 }
  0xa9   : > { %1292 = vmatprep.mubr.msk.f32.mxu1 %vm1420_vm1, %v1419_v0  ;;  %v504_v0 = vand.u32 15, %v498_v61 }
  0xaa   : > { %v274_v14 = vpop.xlane.xlu0 %273 }
  0xab   : > { %1291 = vmatpush3.msk.msra.mxu1 %vm260_vm0, %v274_v14  ;;  %vm543_vm5 = vcmp.ge.s32.totalorder %v504_v0, 1  ;;  %vm688_vm8 = vcmp.le.s32.totalorder %v504_v0, 14 }
  0xac   : > { %1293 = vmatmul.mubr.msk.f32.vlgmr.msra.gmra.mxu1 %vm275_vm2, %v254_v12 }
  0xad   : > { %668 = vmatprep.mubr.bf16.mxu1 %v1421_v11 }
  0xb2   : > { %v458_v33 = vpop.permute.xlu0 %457 }
  0xb3   : > { %v465_v37 = vrot.slane %v458_v33, %v436_v30 }
 0x168   : > { %v348_v16 = vpop.f32.mrf.mxu1 }
 0x169   : > { %429 = vperm.xlu1 %1347, %v348_v16   ;;  %v425_v18 = vmul.f32 %v348_v16, %v348_v16 }
 0x16a   : > { %v1289_v17 = vpop.f32.mrf.mxu1 }
 0x16c   : > { %v421_v19 = vpop.f32.mrf.mxu1 }
 0x16d   : > { %v426_v20 = vsub.f32 %v421_v19, %v425_v18  ;;  %v576_v19 = vpack.c.bf16 %v1248_v13, %v1248_v13 }
 0x16e   : > { %v1294_v21 = vpop.f32.mrf.mxu1 }
 0x16f   : > { %v440_v22 = vadd.f32 1e-05, %v426_v20 }
 0x171   : > { %1349 = vrsqrt.f32 %v440_v22 }
 0x17e   : > { %v1350_v23 = vpop.eup %1349 }
 0x17f   : > { %444 = vperm.xlu1 %1347, %v1350_v23   ;;  %v563_v23 = vld [vmem:[%s1726_s4] sm:$0xff] }
 0x180   : > { %v564_v28 = vpack.c.bf16 %v563_v23, %v563_v23 }
 0x183   : > { %470 = vperm.xlu1 %1347, %v256_v24  }
 0x1e4   : > { %v430_v31 = vpop.permute.xlu1 %429 }
 0x1e5   : > { %v437_v32 = vrot.slane %v430_v31, %v436_v30  ;;  %v1253_v31 = vld [vmem:[%s1726_s4 + $0x10] sm:$0xff] }
 0x1e7   : > { %v439_v35 = vsub.f32 %v253_v1, %v437_v32  ;;  %v511_v1 = vand.u32 15, %v499_v62 }
 0x1e9   : > { %vm544_vm6 = vcmp.ge.s32.totalorder %v511_v1, 1  ;;  %vm689_vm9 = vcmp.le.s32.totalorder %v511_v1, 14 }
 0x1ea   : > { %vm549_vm7 = vmpackc.low %vm544_vm6, %vm543_vm5  ;;  %vm890_vm5 = vcmask 1039360   ;;  %vm958_vm6 = vcmask 924672  }
 0x1eb   : > { %v550_v5 = vsel %vm549_vm7, 65537, %v1421_v11  ;;  %vm694_vm10 = vmpackc.low %vm689_vm9, %vm688_vm8  ;;  %vm1026_vm7 = vcmask 916480   ;;  %vm1089_vm8 = vcmask 908288  }
 0x1ec   : > { %v1572_v8 = vrot.slane %v550_v5, %v553_v4  ;;  %v695_v9 = vsel %vm694_vm10, 65537, %v1421_v11  ;;  %v1575_v12 = vrot.slane %v550_v5, %v557_v6 }
 0x1ed   : > { %v1582_v16 = vrot.slane %v695_v9, %v553_v4  ;;  %v1587_v20 = vrot.slane %v695_v9, %v557_v6 }
 0x1ee   : > { %vm559_vm14 = vcmp.ne.s16.totalorder %v1572_v8, 0  ;;  %vm560_vm0 = vcmp.ne.s16.totalorder %v1575_v12, 0 }
 0x1ef   : > { %vm704_vm1 = vcmp.ne.s16.totalorder %v1582_v16, 0 }
 0x1fa   : > { %v445_v34 = vpop.permute.xlu1 %444 }
 0x1fb   : > { %v452_v36 = vrot.slane %v445_v34, %v436_v30 }
 0x1fd   : > { %v454_v38 = vmul.f32 %v452_v36, %v439_v35  ;;  %v710_v36 = vpack.c.bf16 %v1253_v31, %v1253_v31 }
 0x1fe   : > { %v471_v39 = vpop.permute.xlu1 %470 }
 0x1ff   : > { %v467_v40 = vmul.f32 %v465_v37, %v454_v38  ;;  %v478_v41 = vrot.slane %v471_v39, %v436_v30  ;;  %v1256_v39 = vld [vmem:[%s1726_s4 + $0x18] sm:$0xff] }
 0x201   : > { %v480_v42 = vadd.f32 %v478_v41, %v467_v40 }
 0x203   : > { %v482_v43 = vmin.f32 %v480_v42, 20.0  ;;  %vm481_vm4 = vcmp.gt.f32.partialorder %v480_v42, 20.0 }
 0x205   : > { %v483_v44 = vmul.f32 1.442695, %v482_v43 }
 0x207   : > { %1351 = vpow2.f32 %v483_v44  ;;  %v778_v44 = vpack.c.bf16 %v1256_v39, %v1256_v39 }
 0x214   : > { %v1352_v45 = vpop.eup %1351 }
 0x215   : > { %v485_v46 = vadd.f32 1.0, %v1352_v45  ;;  %v488_v47 = vmul.f32 -0.5, %v1352_v45  ;;  %v491_v49 = vand.u32 2147483647, %v1352_v45 }
 0x217   : > { %1353 = vlog2.f32 %v485_v46  ;;  %v489_v48 = vadd.f32 1.0, %v488_v47  ;;  %vm492_vm3 = vcmp.lt.f32.partialorder %v491_v49, 0.0004427343  ;;  %v1259_v46 = vld [vmem:[%s1726_s4 + $0x20] sm:$0xff] }
 0x218   : > { %v833_v47 = vpack.c.bf16 %v1259_v46, %v1259_v46 }
 0x219   : > { %v490_v52 = vmul.f32 %v1352_v45, %v489_v48 }
 0x224   : > { %v1354_v50 = vpop.eup %1353 }
 0x225   : > { %v487_v51 = vmul.f32 0.6931472, %v1354_v50  ;;  %v1262_v50 = vld [vmem:[%s1726_s4 + $0x28] sm:$0xff] }
 0x227   : > { %v493_v53 = vsel %vm492_vm3, %v490_v52, %v487_v51  ;;  %vm767_vm3 = vcmask 7168  }
 0x228   : > { %v494_v54 = vsel %vm481_vm4, %v480_v42, %v493_v53  ;;  %vm705_vm4 = vcmp.ne.s16.totalorder %v1587_v20, 0 }
 0x229   : > { %1355 = vtanh.f32 %v494_v54 }
 0x236   : > { %v1356_v55 = vpop.eup %1355 }
 0x237   : > { %v496_v56 = vmul.f32 %v1356_v55, %v480_v42 }
 0x239   : > { %v1545_v57 = vpack.c.bf16 %v496_v56, %v496_v56  ;;  %v525_v59 = vcombine.high %v496_v56, %v496_v56  ;;  %v901_v56 = vpack.c.bf16 %v1262_v50, %v1262_v50 }
 0x23b   : > { %954 = vrot.lane.b32.xlu0 %v1545_v57, %s1423_s20  ;;  %565 = vrot.lane.b32.xlu1 %v1545_v57, %s1424_s26  ;;  %v1557_v60 = vpack.c.bf16 %v525_v59, %v525_v59  ;;  %v838_v43 = vsel %vm580_vm13, %v1545_v57, 0 }
 0x23f   : > { %1022 = vrot.lane.b32.xlu0 %v1545_v57, %s1425_s28  ;;  %531 = vrot.lane.b32.xlu1 %v1545_v57, %s1426_s29 }
 0x243   : > { %1085 = vrot.lane.b32.xlu0 %v1545_v57, %s1427_s9  ;;  %677 = vrot.lane.b32.xlu1 %v1545_v57, %s1428_s10 }
 0x247   : > { %1156 = vperm.xlu0 %1346, %v1153_v58   ;;  %763 = vrot.lane.b32.xlu1 %v1545_v57, %s1429_s13  ;;  %v1265_v58 = vld [vmem:[%s1726_s4 + $0x30] sm:$0xff] }
 0x248   : > { %v969_v1 = vpack.c.bf16 %v1265_v58, %v1265_v58 }
 0x24b   : > { %567 = vrot.lane.b32.xlu1 %v1557_v60, %s1424_s26  ;;  %s244_s26 = scalar_lea.vmem [#allocation2], %s1241_s19 }
 0x24f   : > { %533 = vrot.lane.b32.xlu1 %v1557_v60, %s1426_s29 }
 0x253   : > { %679 = vrot.lane.b32.xlu1 %v1557_v60, %s1428_s10 }
 0x257   : > { %765 = vrot.lane.b32.xlu1 %v1557_v60, %s1429_s13 }
 0x25b   : > { %886 = vrot.lane.b32.xlu1 %v1545_v57, %s1430_s14 }
 0x25f   : > { %888 = vrot.lane.b32.xlu1 %v1557_v60, %s1430_s14 }
 0x263   : > { %956 = vrot.lane.b32.xlu1 %v1557_v60, %s1423_s20  ;;  %s1280_s20 = sshll.u32 %s1488_s25, 8  ;;  %s1431_s25 = smov [#allocation2]  }
 0x264   : > { %s1685_s10 = scalar_lea.hbm %s1728_s6, %s1280_s20  ;;  %s1361_s13 = sshll.u32 %s1431_s25, 4  ;;  %s1362_s13 = int_to_ptr.vmem [resolvable:$false] %s1361_s13 }
 0x265   : > { %s1363_s14 = scalar_lea.vmem %s1362_s13, 512 }
 0x267   : > { %1024 = vrot.lane.b32.xlu1 %v1557_v60, %s1425_s28  ;;  %s1178_s28 = sshll.u32 %s244_s26, 4  ;;  %s1179_s28 = int_to_ptr.vmem [resolvable:$true] %s1178_s28 }
 0x268   : > { %s1357_s12 = scalar_lea.vmem %s1179_s28, 256  ;;  %p1364_p0 = scmp.lt.s32.totalorder %s1179_s28, %s1362_s13 }
 0x269   : > { %p1358_p11 = scmp.ne.s32.totalorder %s1179_s28, %s1357_s12  ;;  %p1365_p1 = scmp.lt.s32.totalorder %s1363_s14, %s1357_s12 }
 0x26b   : > { %1087 = vrot.lane.b32.xlu1 %v1557_v60, %s1427_s9  ;;  %p1359_p12 = pnand %p1358_p11, %p1505_p5  ;;  %p1366_p2 = por %p1365_p1, %p1364_p0 }
 0x26d   : > { %p1360_p13 = pneg %p1359_p12 }
 0x26f   : > { %p1367_p3 = pnand %p1366_p2, %p1360_p13 }
 0x2ad   : > { %v566_v63 = vpop.permute.xlu1 %565  ;;  %v955_v48 = vpop.permute.xlu0 %954 }
 0x2ae   : > { %v573_v10 = vsel %vm569_vm11, 0, %v566_v63 }
 0x2af   : > { %v581_v18 = vsel %vm580_vm13, %v573_v10, 0  ;;  %v1271_v10 = vld [vmem:[%s1726_s4 + $0x40] sm:$0xff] }
 0x2b1   : > { %v532_v2 = vpop.permute.xlu1 %531  ;;  %v1023_v61 = vpop.permute.xlu0 %1022 }
 0x2b2   : > { %v541_v15 = vsel %vm535_vm12, 0, %v532_v2 }
 0x2b3   : > { %v561_v21 = vsel %vm559_vm14, %v541_v15, 0 }
 0x2b4   : > { %v631_v27 = vsel %vm580_vm13, %v561_v21, 0 }
 0x2b5   : > { %v678_v3 = vpop.permute.xlu1 %677  ;;  %v1086_v8 = vpop.permute.xlu0 %1085 }
 0x2b6   : > { %v686_v24 = vsel %vm681_vm15, 0, %v678_v3 }
 0x2b7   : > { %v706_v29 = vsel %vm704_vm1, %v686_v24, 0 }
 0x2b8   : > { %v715_v35 = vsel %vm580_vm13, %v706_v29, 0 }
 0x2b9   : > { %v764_v7 = vpop.permute.xlu1 %763 }
 0x2ba   : > { %v772_v32 = vsel %vm767_vm3, 0, %v764_v7 }
 0x2bb   : > { %v774_v37 = vsel %vm559_vm14, %v772_v32, 0 }
 0x2bc   : > { %v783_v42 = vsel %vm580_vm13, %v774_v37, 0 }
 0x2bd   : > { %v568_v14 = vpop.permute.xlu1 %567 }
 0x2be   : > { %v570_v17 = vsel %vm569_vm11, %v566_v63, %v568_v14 }
 0x2bf   : > { %1249 = vmatprep.subr.msk.bf16.mxu0 %vm580_vm13, %v570_v17 }
 0x2c0   : > { %601 = vmatpush1.bf16.msra.mxu0 %v581_v18  ;;  %v1100_v18 = vpack.c.bf16 %v1271_v10, %v1271_v10 }
 0x2c1   : > { %v534_v22 = vpop.permute.xlu1 %533 }
 0x2c2   : > { %v536_v25 = vsel %vm535_vm12, %v532_v2, %v534_v22 }
 0x2c3   : > { %v562_v26 = vsel %vm560_vm0, %v536_v25, 0  ;;  %1250 = vmatmul.mubr.msk.bf16.vlgmr.msra.gmra.mxu0 %vm275_vm2, %v576_v19 }
 0x2c4   : > { %1251 = vmatprep.subr.msk.bf16.mxu1 %vm580_vm13, %v562_v26  ;;  %752 = vmatprep.mubr.bf16.mxu0 %v1421_v11 }
 0x2c5   : > { %651 = vmatpush1.bf16.msra.mxu1 %v631_v27  ;;  %v680_v30 = vpop.permute.xlu1 %679 }
 0x2c6   : > { %v682_v33 = vsel %vm681_vm15, %v678_v3, %v680_v30  ;;  %v1268_v3 = vld [vmem:[%s1726_s4 + $0x38] sm:$0xff] }
 0x2c7   : > { %v707_v34 = vsel %vm705_vm4, %v682_v33, 0 }
 0x2c8   : > { %1252 = vmatmul.mubr.msk.bf16.vlgmr.msra.gmra.mxu1 %vm275_vm2, %v564_v28  ;;  %1254 = vmatprep.subr.msk.bf16.mxu0 %vm580_vm13, %v707_v34 }
 0x2c9   : > { %735 = vmatpush1.bf16.msra.mxu0 %v715_v35  ;;  %v766_v38 = vpop.permute.xlu1 %765  ;;  %820 = vmatprep.mubr.bf16.mxu1 %v1421_v11 }
 0x2ca   : > { %v768_v40 = vsel %vm767_vm3, %v764_v7, %v766_v38  ;;  %1260 = vmatprep.subr.msk.bf16.mxu0 %vm580_vm13, %v1557_v60  ;;  %v1033_v7 = vpack.c.bf16 %v1268_v3, %v1268_v3 }
 0x2cb   : > { %v775_v41 = vsel %vm560_vm0, %v768_v40, 0 }
 0x2cc   : > { %1255 = vmatmul.mubr.msk.bf16.vlgmr.msra.gmra.mxu0 %vm275_vm2, %v710_v36  ;;  %1257 = vmatprep.subr.msk.bf16.mxu1 %vm580_vm13, %v775_v41 }
 0x2cd   : > { %803 = vmatpush1.bf16.msra.mxu1 %v783_v42  ;;  %858 = vmatpush1.bf16.msra.mxu0 %v838_v43  ;;  %v887_v45 = vpop.permute.xlu1 %886 }
 0x2ce   : > { %875 = vmatprep.mubr.bf16.mxu0 %v1421_v11 }
 0x2d0   : > { %1258 = vmatmul.mubr.msk.bf16.vlgmr.msra.gmra.mxu1 %vm275_vm2, %v778_v44 }
 0x2d1   : > { %v889_v49 = vpop.permute.xlu1 %888  ;;  %943 = vmatprep.mubr.bf16.mxu1 %v1421_v11 }
 0x2d2   : > { %v891_v51 = vsel %vm890_vm5, %v887_v45, %v889_v49  ;;  %v895_v52 = vsel %vm890_vm5, %v889_v49, 0 }
 0x2d3   : > { %v897_v53 = vsel %vm704_vm1, %v891_v51, 0  ;;  %v898_v54 = vsel %vm705_vm4, %v895_v52, 0 }
 0x2d4   : > { %1261 = vmatmul.mubr.msk.bf16.vlgmr.msra.gmra.mxu0 %vm275_vm2, %v833_v47  ;;  %1263 = vmatprep.subr.msk.bf16.mxu1 %vm580_vm13, %v898_v54  ;;  %v906_v55 = vsel %vm580_vm13, %v897_v53, 0 }
 0x2d5   : > { %926 = vmatpush1.bf16.msra.mxu1 %v906_v55  ;;  %v957_v57 = vpop.permute.xlu1 %956  ;;  %1011 = vmatprep.mubr.bf16.mxu0 %v1421_v11 }
 0x2d6   : > { %v959_v59 = vsel %vm958_vm6, %v955_v48, %v957_v57  ;;  %v963_v60 = vsel %vm958_vm6, %v957_v57, 0 }
 0x2d7   : > { %v965_v62 = vsel %vm559_vm14, %v959_v59, 0  ;;  %v966_v63 = vsel %vm560_vm0, %v963_v60, 0 }
 0x2d8   : > { %1264 = vmatmul.mubr.msk.bf16.vlgmr.msra.gmra.mxu1 %vm275_vm2, %v901_v56  ;;  %1266 = vmatprep.subr.msk.bf16.mxu0 %vm580_vm13, %v966_v63  ;;  %v974_v0 = vsel %vm580_vm13, %v965_v62, 0  ;;  %v1157_v62 = vpop.permute.xlu0 %1156 }
 0x2d9   : > { %994 = vmatpush1.bf16.msra.mxu0 %v974_v0  ;;  %v1025_v2 = vpop.permute.xlu1 %1024  ;;  %1074 = vmatprep.mubr.bf16.mxu1 %v1421_v11 }
 0x2da   : > { %v1027_v4 = vsel %vm1026_vm7, %v1023_v61, %v1025_v2  ;;  %v1030_v5 = vsel %vm1026_vm7, %v1025_v2, 0 }
 0x2db   : > { %v1038_v6 = vsel %vm580_vm13, %v1027_v4, 0  ;;  %1269 = vmatprep.subr.msk.bf16.mxu1 %vm580_vm13, %v1030_v5 }
 0x2dc   : > { %1267 = vmatmul.mubr.msk.bf16.vlgmr.msra.gmra.mxu0 %vm275_vm2, %v969_v1  ;;  %1057 = vmatpush1.bf16.msra.mxu1 %v1038_v6 }
 0x2dd   : > { %v1088_v9 = vpop.permute.xlu1 %1087  ;;  %1142 = vmatprep.mubr.bf16.mxu0 %v1421_v11 }
 0x2de   : > { %v1090_v12 = vsel %vm1089_vm8, %v1086_v8, %v1088_v9  ;;  %v1094_v13 = vsel %vm1089_vm8, %v1088_v9, 0 }
 0x2df   : > { %v1096_v14 = vsel %vm704_vm1, %v1090_v12, 0  ;;  %v1097_v15 = vsel %vm705_vm4, %v1094_v13, 0 }
 0x2e0   : > { %1270 = vmatmul.mubr.msk.bf16.vlgmr.msra.gmra.mxu1 %vm275_vm2, %v1033_v7  ;;  %1272 = vmatprep.subr.msk.bf16.mxu0 %vm580_vm13, %v1097_v15  ;;  %v1105_v17 = vsel %vm580_vm13, %v1096_v14, 0 }
 0x2e1   : > { %1125 = vmatpush1.bf16.msra.mxu0 %v1105_v17 }
 0x2e4   : > { %1273 = vmatmul.mubr.msk.bf16.vlgmr.msra.gmra.mxu0 %vm275_vm2, %v1100_v18 }
 0x383   : > { %v620_v11 = vpop.f32.mrf.mxu0 }
 0x385   : > { %v622_v19 = vpop.f32.mrf.mxu0 }
 0x387   : > { %v624_v21 = vpop.f32.mrf.mxu0 }
 0x388   : > { %v670_v22 = vpop.f32.mrf.mxu1 }
 0x389   : > { %v625_v23 = vpop.f32.mrf.mxu0  ;;  %v671_v35 = vadd.f32 %v670_v22, %v620_v11 }
 0x38a   : > { %v672_v16 = vpop.f32.mrf.mxu1 }
 0x38b   : > { %v673_v38 = vadd.f32 %v672_v16, %v622_v19 }
 0x38c   : > { %v674_v24 = vpop.f32.mrf.mxu1  ;;  %v754_v25 = vpop.f32.mrf.mxu0 }
 0x38d   : > { %v761_v39 = vadd.f32 %v754_v25, %v671_v35 }
 0x38e   : > { %v675_v20 = vpop.f32.mrf.mxu1  ;;  %v756_v26 = vpop.f32.mrf.mxu0 }
 0x38f   : > { %v762_v42 = vadd.f32 %v756_v26, %v673_v38 }
 0x390   : > { %v758_v27 = vpop.f32.mrf.mxu0  ;;  %v822_v28 = vpop.f32.mrf.mxu1 }
 0x391   : > { %v829_v43 = vadd.f32 %v822_v28, %v761_v39 }
 0x392   : > { %v759_v29 = vpop.f32.mrf.mxu0  ;;  %v824_v30 = vpop.f32.mrf.mxu1 }
 0x393   : > { %v830_v46 = vadd.f32 %v824_v30, %v762_v42 }
 0x394   : > { %v826_v31 = vpop.f32.mrf.mxu1  ;;  %v877_v32 = vpop.f32.mrf.mxu0 }
 0x395   : > { %v884_v47 = vadd.f32 %v877_v32, %v829_v43 }
 0x396   : > { %v827_v33 = vpop.f32.mrf.mxu1  ;;  %v879_v34 = vpop.f32.mrf.mxu0 }
 0x397   : > { %v885_v50 = vadd.f32 %v879_v34, %v830_v46 }
 0x398   : > { %v881_v36 = vpop.f32.mrf.mxu0  ;;  %v945_v37 = vpop.f32.mrf.mxu1 }
 0x399   : > { %v952_v51 = vadd.f32 %v945_v37, %v884_v47 }
 0x39a   : > { %v882_v40 = vpop.f32.mrf.mxu0  ;;  %v947_v41 = vpop.f32.mrf.mxu1 }
 0x39b   : > { %v953_v54 = vadd.f32 %v947_v41, %v885_v50 }
 0x39c   : > { %v949_v44 = vpop.f32.mrf.mxu1  ;;  %v1013_v45 = vpop.f32.mrf.mxu0 }
 0x39d   : > { %v1020_v55 = vadd.f32 %v1013_v45, %v952_v51 }
 0x39e   : > { %v950_v48 = vpop.f32.mrf.mxu1  ;;  %v1015_v49 = vpop.f32.mrf.mxu0 }
 0x39f   : > { %v1021_v58 = vadd.f32 %v1015_v49, %v953_v54 }
 0x3a0   : > { %v1017_v52 = vpop.f32.mrf.mxu0  ;;  %v1076_v53 = vpop.f32.mrf.mxu1 }
 0x3a1   : > { %v1083_v59 = vadd.f32 %v1076_v53, %v1020_v55 }
 0x3a2   : > { %v1018_v56 = vpop.f32.mrf.mxu0  ;;  %v1078_v57 = vpop.f32.mrf.mxu1 }
 0x3a3   : > { %v1084_v63 = vadd.f32 %v1078_v57, %v1021_v58 }
 0x3a4   : > { %v1144_v60 = vpop.f32.mrf.mxu0  ;;  %v1080_v61 = vpop.f32.mrf.mxu1 }
 0x3a5   : > { %v1151_v0 = vadd.f32 %v1144_v60, %v1083_v59 }
 0x3a6   : > { %v1146_v1 = vpop.f32.mrf.mxu0  ;;  %v1081_v2 = vpop.f32.mrf.mxu1 }
 0x3a7   : > { %v1159_v3 = vadd.f32 %v1157_v62, %v1151_v0  ;;  %v1152_v4 = vadd.f32 %v1146_v1, %v1084_v63 }
 0x3a8   : > { %v1148_v5 = vpop.f32.mrf.mxu0 }
 0x3a9   : > { %1161 = vst [vmem:[%s244_s26] sm:$0xff] %v1159_v3  ;;  %v1160_v6 = vadd.f32 %v1157_v62, %v1152_v4 }
 0x3aa   : > { %v1149_v7 = vpop.f32.mrf.mxu0 }
 0x3ab   : > { %1162 = vst [vmem:[%s244_s26 + $0x8] sm:$0xff] %v1160_v6 }
 0x3ac   : > { %1370 = shalt.err (!%p1367_p3)
}
 0x3ad   : > { %s1371_s15 = scalar_lea.hbm %s1685_s10, 256  ;;  %s1375_s18 = scalar_lea.hbm %s1728_s6, 512 }
 0x3ae   : > { %p1372_p4 = scmp.ne.s32.totalorder %s1685_s10, %s1371_s15  ;;  %p1376_p9 = scmp.lt.s32.totalorder %s1685_s10, %s1728_s6 }
 0x3af   : > { %p1377_p10 = scmp.lt.s32.totalorder %s1375_s18, %s1371_s15 }
 0x3b0   : > { %p1373_p7 = pnand %p1372_p4, %p1505_p5 }
 0x3b1   : > { %p1378_p11 = por %p1377_p10, %p1376_p9 }
 0x3b2   : > { %p1374_p8 = pneg %p1373_p7 }
 0x3b4   : > { %p1379_p12 = pnand %p1378_p11, %p1374_p8 }
 0x3b6   : > { %1382 = shalt.err (!%p1379_p12)
}
 0x3b7   : > { %1295 = dma.vmem_to_hbm [thread:$0]  (%p1505_p5), %s1179_s28, 256, %s1685_s10, %s1164_s11  }
 0x3b8 PF: > { %p1301_p13 = scmp.ge.s32.totalorder %s1417_s24, 2  ;;  %s1190_s26 = sand.u32 1, %s1405_s21  }
 0x3b9   : > { %s1191_s29 = scalar_lea.sflag [#allocation3], %s1190_s26 }
 0x3ba   : > { %p1298_p0 = pnand %p1301_p13, %p1509_p6 }
 0x3bc   : > { %p1299_p1 = pneg %p1298_p0 }
 0x3be   : > { %1400 = dma.done.wait (%p1299_p1), %s1191_s29, 256  }
 0x3bf   : > { %1402 = vsyncadd (%p1299_p1), %s1191_s29, 4294967040  ;;  %p16_p2 = scmp.ge.s32.totalorder %s1492_s27, 4   ;;  %s1731_s21 = smov %s1409_s22 }
 0x3c0   : > { %s1732_s22 = smov %s1413_s23  ;;  %s1733_s23 = smov %s1503_s30 }
 0x3c1   : > { %s1734_s24 = smov %s1492_s27  ;;  %18 = sbr.rel (!%p16_p2) target bundleno = 3 (0x3), region = 87 }
 0x3c6   :  { %1196 = vsyncpa [#allocation3], 1 }
 0x3c7   :  { %1198 = vsyncpa [#allocation3 + $0x1], 1 }

</bundles_post_ra>
